<compile_context>
chip_gen: v5e
topology: v5e:2x2
jax: 0.10.0
libtpu: 0.0.40
codegen_flags: <defaults>
</compile_context>

<pallas_src>
import jax
import jax.numpy as jnp
from jax.experimental import pallas as pl
from jax.experimental.pallas import tpu as pltpu


def _round_up(x, m):
    return (x + m - 1) // m * m


def classblock_kernel(x_ref, w1_ref, b1_ref, w2_ref, b2_ref, out_ref):
    # ---- add_block: Linear (BN already folded into w1/b1) ----
    h = jnp.dot(x_ref[...], w1_ref[...], preferred_element_type=jnp.float32)
    h = h + b1_ref[...]
    # relu=False -> no LeakyReLU ; dropout is identity at inference
    # ---- classifier: Linear ----
    out_ref[...] = (
        jnp.dot(h.astype(jnp.bfloat16), w2_ref[...],
                preferred_element_type=jnp.float32) + b2_ref[...])


def class_block_forward(x, params, *, batch_tile=256):
    """x: [B, input_dim] float32.  Returns logits [B, class_num] float32."""
    w1, b1, gamma, beta, mean, var, w2, b2 = params
    B, K = x.shape
    NB = w1.shape[1]
    CN = w2.shape[1]

    # ---- fold eval-mode BatchNorm into the first Linear (wrapper side) ----
    inv_std = gamma * jax.lax.rsqrt(var + 1e-5)          # (1, NB)
    w1_f = w1 * inv_std                                   # scale output columns
    b1_f = (b1 - mean) * inv_std + beta                   # (1, NB)

    # ---- lane-dense padding (multiples of 128 on feature axes) ----
    K_p = _round_up(K, 128)
    NB_p = _round_up(NB, 128)
    CN_p = _round_up(CN, 128)

    # ---- batch tiling (TB multiple of 8, weights stay resident across grid) ----
    TB = min(batch_tile, _round_up(B, 8))
    B_p = _round_up(B, TB)
    grid = (B_p // TB,)

    x_p = jnp.pad(x, ((0, B_p - B), (0, K_p - K))).astype(jnp.bfloat16)
    w1_p = jnp.pad(w1_f, ((0, K_p - K), (0, NB_p - NB))).astype(jnp.bfloat16)
    b1_p = jnp.pad(b1_f, ((0, 0), (0, NB_p - NB))).astype(jnp.float32)
    w2_p = jnp.pad(w2, ((0, NB_p - NB), (0, CN_p - CN))).astype(jnp.bfloat16)
    b2_p = jnp.pad(b2, ((0, 0), (0, CN_p - CN))).astype(jnp.float32)

    grid_spec = pl.GridSpec(
        grid=grid,
        in_specs=[
            pl.BlockSpec((TB, K_p), lambda i: (i, 0)),     # x: tiled over batch
            pl.BlockSpec((K_p, NB_p), lambda i: (0, 0)),   # w1: resident
            pl.BlockSpec((1, NB_p), lambda i: (0, 0)),     # b1: resident
            pl.BlockSpec((NB_p, CN_p), lambda i: (0, 0)),  # w2: resident
            pl.BlockSpec((1, CN_p), lambda i: (0, 0)),     # b2: resident
        ],
        out_specs=pl.BlockSpec((TB, CN_p), lambda i: (i, 0)),
    )

    flops = 2 * B_p * (K_p * NB_p + NB_p * CN_p)
    bytes_accessed = (x_p.size * 2 + w1_p.size * 2 + w2_p.size * 2
                      + b1_p.size * 4 + b2_p.size * 4 + B_p * CN_p * 4)

    # VMEM budget: double-buffered x/out tiles + resident weights/biases + intermediate.
    est_vmem = (2 * (TB * K_p * 2 + TB * CN_p * 4)
                + 2 * (K_p * NB_p * 2 + NB_p * CN_p * 2)
                + 2 * (NB_p * 4 + CN_p * 4)
                + TB * NB_p * 4)
    vmem_limit = int(min(max(2 * est_vmem, 8 << 20), 60 << 20))

    out_p = pl.pallas_call(
        classblock_kernel,
        out_shape=jax.ShapeDtypeStruct((B_p, CN_p), jnp.float32),
        grid_spec=grid_spec,
        compiler_params=pltpu.CompilerParams(
            dimension_semantics=("parallel",),
            vmem_limit_bytes=vmem_limit,
        ),
        cost_estimate=pl.CostEstimate(
            flops=flops, transcendentals=0, bytes_accessed=bytes_accessed),
    )(x_p, w1_p, b1_p, w2_p, b2_p)

    return out_p[:B, :CN]


def init_classblock_params(key, input_dim, class_num, num_bottleneck):
    """Deterministic init mirroring weights_init_kaiming / weights_init_classifier."""
    k1, k2, k3 = jax.random.split(key, 3)
    # Linear(input_dim, num_bottleneck): kaiming_normal_ mode='fan_out'
    # std = sqrt(2 / fan_out) = sqrt(2 / num_bottleneck); stored as [in, out].
    std1 = (2.0 / num_bottleneck) ** 0.5
    w1 = jax.random.normal(k1, (input_dim, num_bottleneck), jnp.float32) * std1
    b1 = jnp.zeros((1, num_bottleneck), jnp.float32)
    # BatchNorm1d: weight ~ N(1, 0.02), bias = 0, running_mean=0, running_var=1
    gamma = 1.0 + 0.02 * jax.random.normal(k2, (1, num_bottleneck), jnp.float32)
    beta = jnp.zeros((1, num_bottleneck), jnp.float32)
    mean = jnp.zeros((1, num_bottleneck), jnp.float32)
    var = jnp.ones((1, num_bottleneck), jnp.float32)
    # classifier Linear(num_bottleneck, class_num): normal std=0.001, bias=0
    w2 = jax.random.normal(k3, (num_bottleneck, class_num), jnp.float32) * 0.001
    b2 = jnp.zeros((1, class_num), jnp.float32)
    return (w1, b1, gamma, beta, mean, var, w2, b2)


def reference_forward(x, params):
    w1, b1, gamma, beta, mean, var, w2, b2 = params
    h = x @ w1 + b1
    h = (h - mean) / jnp.sqrt(var + 1e-5) * gamma + beta
    return h @ w2 + b2


if __name__ == "__main__":
    B, INPUT_DIM, BOTTLENECK, CLASS_NUM = 8, 64, 128, 16

    key = jax.random.PRNGKey(0)
    kx, kp = jax.random.split(key)
    x = jax.random.normal(kx, (B, INPUT_DIM), jnp.float32)
    params = init_classblock_params(kp, INPUT_DIM, CLASS_NUM, BOTTLENECK)

    out = class_block_forward(x, params)
    out = jax.block_until_ready(out)

    ref = reference_forward(x, params)
    assert out.shape == (B, CLASS_NUM)
    # bf16 matmul operands (f32 accumulation) -> compare with a relative-error bound.
    rel_err = float(jnp.max(jnp.abs(out - ref)) / (jnp.max(jnp.abs(ref)) + 1e-12))
    assert rel_err < 2e-2, f"mismatch vs reference, rel_err={rel_err}"

    print("KERNEL_OK")
</pallas_src>

<mosaic_0001>
module attributes {stable_mosaic.version = 11 : i64} {
  func.func @classblock_kernel(%arg0: i32, %arg1: memref<8x128xbf16, #tpu.memory_space<vmem>>, %arg2: memref<128x128xbf16, #tpu.memory_space<vmem>>, %arg3: memref<1x128xf32, #tpu.memory_space<vmem>>, %arg4: memref<128x128xbf16, #tpu.memory_space<vmem>>, %arg5: memref<1x128xf32, #tpu.memory_space<vmem>>, %arg6: memref<8x128xf32, #tpu.memory_space<vmem>>) attributes {dimension_semantics = [#tpu.dimension_semantics<parallel>], iteration_bounds = array<i64: 1>, scalar_prefetch = 0 : i64, scratch_operands = 0 : i64, tpu.core_type = #tpu.core_type<tc>, window_params = [{transform_indices = @transform_0, window_bounds = array<i64: 8, 128>}, {pipeline_mode = #tpu.pipeline_mode<synchronous>, transform_indices = @transform_1, window_bounds = array<i64: 128, 128>}, {pipeline_mode = #tpu.pipeline_mode<synchronous>, transform_indices = @transform_2, window_bounds = array<i64: 1, 128>}, {pipeline_mode = #tpu.pipeline_mode<synchronous>, transform_indices = @transform_3, window_bounds = array<i64: 128, 128>}, {pipeline_mode = #tpu.pipeline_mode<synchronous>, transform_indices = @transform_4, window_bounds = array<i64: 1, 128>}, {transform_indices = @transform_5, window_bounds = array<i64: 8, 128>}]} {
    %c0 = arith.constant 0 : index
    %c0_0 = arith.constant 0 : index
    %0 = vector.load %arg1[%c0, %c0_0] : memref<8x128xbf16, #tpu.memory_space<vmem>>, vector<8x128xbf16>
    %c0_1 = arith.constant 0 : index
    %c0_2 = arith.constant 0 : index
    %1 = vector.load %arg2[%c0_1, %c0_2] : memref<128x128xbf16, #tpu.memory_space<vmem>>, vector<128x128xbf16>
    %cst = arith.constant dense<0.000000e+00> : vector<8x128xf32>
    %2 = tpu.matmul %0, %1, %cst {dimension_numbers = #tpu.dot_dimension_numbers<[1], [0], [0], [1], [0, 0, 1, 1], [], []>} : vector<8x128xbf16>, vector<128x128xbf16>, vector<8x128xf32> -> vector<8x128xf32>
    %c0_3 = arith.constant 0 : index
    %c0_4 = arith.constant 0 : index
    %3 = vector.load %arg3[%c0_3, %c0_4] : memref<1x128xf32, #tpu.memory_space<vmem>>, vector<1x128xf32>
    %4 = vector.broadcast %3 : vector<1x128xf32> to vector<8x128xf32>
    %5 = arith.addf %2, %4 : vector<8x128xf32>
    %6 = arith.truncf %5 : vector<8x128xf32> to vector<8x128xbf16>
    %c0_5 = arith.constant 0 : index
    %c0_6 = arith.constant 0 : index
    %7 = vector.load %arg4[%c0_5, %c0_6] : memref<128x128xbf16, #tpu.memory_space<vmem>>, vector<128x128xbf16>
    %cst_7 = arith.constant dense<0.000000e+00> : vector<8x128xf32>
    %8 = tpu.matmul %6, %7, %cst_7 {dimension_numbers = #tpu.dot_dimension_numbers<[1], [0], [0], [1], [0, 0, 1, 1], [], []>} : vector<8x128xbf16>, vector<128x128xbf16>, vector<8x128xf32> -> vector<8x128xf32>
    %c0_8 = arith.constant 0 : index
    %c0_9 = arith.constant 0 : index
    %9 = vector.load %arg5[%c0_8, %c0_9] : memref<1x128xf32, #tpu.memory_space<vmem>>, vector<1x128xf32>
    %10 = vector.broadcast %9 : vector<1x128xf32> to vector<8x128xf32>
    %11 = arith.addf %8, %10 : vector<8x128xf32>
    %c0_10 = arith.constant 0 : index
    %c0_11 = arith.constant 0 : index
    %12 = vector.load %arg6[%c0_10, %c0_11] : memref<8x128xf32, #tpu.memory_space<vmem>>, vector<8x128xf32>
    tpu.vector_store %arg6[%c0_10, %c0_11], %11 {strides = array<i32>} : memref<8x128xf32, #tpu.memory_space<vmem>>, vector<8x128xf32>,
    return
  }
  func.func @transform_0(%arg0: i32) -> (i32, i32) {
    %c0_i32 = arith.constant 0 : i32
    %c0_i32_0 = arith.constant 0 : i32
    return %arg0, %c0_i32 : i32, i32
  }
  func.func @transform_1(%arg0: i32) -> (i32, i32) {
    %c0_i32 = arith.constant 0 : i32
    %c0_i32_0 = arith.constant 0 : i32
    %c0_i32_1 = arith.constant 0 : i32
    return %c0_i32, %c0_i32_0 : i32, i32
  }
  func.func @transform_2(%arg0: i32) -> (i32, i32) {
    %c0_i32 = arith.constant 0 : i32
    %c0_i32_0 = arith.constant 0 : i32
    %c0_i32_1 = arith.constant 0 : i32
    return %c0_i32, %c0_i32_0 : i32, i32
  }
  func.func @transform_3(%arg0: i32) -> (i32, i32) {
    %c0_i32 = arith.constant 0 : i32
    %c0_i32_0 = arith.constant 0 : i32
    %c0_i32_1 = arith.constant 0 : i32
    return %c0_i32, %c0_i32_0 : i32, i32
  }
  func.func @transform_4(%arg0: i32) -> (i32, i32) {
    %c0_i32 = arith.constant 0 : i32
    %c0_i32_0 = arith.constant 0 : i32
    %c0_i32_1 = arith.constant 0 : i32
    return %c0_i32, %c0_i32_0 : i32, i32
  }
  func.func @transform_5(%arg0: i32) -> (i32, i32) {
    %c0_i32 = arith.constant 0 : i32
    %c0_i32_0 = arith.constant 0 : i32
    return %arg0, %c0_i32 : i32, i32
  }
}

</mosaic_0001>

<bundles_post_ra>
// kernel: tpu_custom_call.1
= control target key start
LH: loop header
LB: loop body
LE: loop exit
PB: predicated region body
PF: predicated region fallthrough
CT: control target
= control target key end

     0   :  { %10 = vsyncpa [#allocation3], 0  ;;  %s493_s0 = inlined_call_operand.hbm [shape: bf16[8,128], index: 0, kind: input, shape index: {}]   ;;  %s494_s1 = inlined_call_operand.hbm [shape: bf16[128,128], index: 1, kind: input, shape index: {}]   ;;  %s495_s2 = inlined_call_operand.vmem [shape: f32[1,128], index: 2, kind: input, shape index: {}]   ;;  %s496_s3 = inlined_call_operand.hbm [shape: bf16[128,128], index: 3, kind: input, shape index: {}]   ;;  %s497_s4 = inlined_call_operand.vmem [shape: f32[1,128], index: 4, kind: input, shape index: {}]   ;;  %s498_s5 = inlined_call_operand.hbm [shape: f32[8,128], index: 5, kind: output, shape index: {}]  }
   0x1   :  { %11 = vsyncpa [#allocation6], 0  ;;  %s28_s20 = sshll.u32 %s494_s1, 4  ;;  %s29_s20 = int_to_ptr.hbm [resolvable:$true] %s28_s20 }
   0x2   :  { %12 = vsyncpa [#allocation4], 0  ;;  %s439_s21 = smov [#allocation5]   ;;  %s18_s25 = sshll.u32 %s493_s0, 4  ;;  %s19_s25 = int_to_ptr.hbm [resolvable:$true] %s18_s25 }
   0x3   :  { %s30_s22 = sshll.u32 %s439_s21, 4  ;;  %s440_s26 = smov 64   ;;  %s31_s22 = int_to_ptr.vmem [resolvable:$true] %s30_s22 }
   0x4   :  { %s441_s27 = smov 4   ;;  %s442_s28 = smov [#allocation2]  }
   0x5   :  { %36 = dma.hbm_to_vmem [thread:$0]  %s29_s20, 1024, %s31_s22, [#allocation6], %s440_s26, %s440_s26, %s441_s27  }
   0x6   :  { %s20_s29 = sshll.u32 %s442_s28, 4  ;;  %s43_s7 = sshll.u32 %s496_s3, 4  ;;  %s21_s29 = int_to_ptr.vmem [resolvable:$true] %s20_s29  ;;  %s44_s7 = int_to_ptr.hbm [resolvable:$true] %s43_s7 }
   0x7   :  { %23 = dma.hbm_to_vmem [thread:$0]  %s19_s25, 64, %s21_s29, [#allocation3]  }
   0x8   :  { %s443_s1 = smov [#allocation7]  }
   0x9   :  { %s45_s8 = sshll.u32 %s443_s1, 4  ;;  %s46_s8 = int_to_ptr.vmem [resolvable:$true] %s45_s8 }
   0xa   :  { %51 = dma.hbm_to_vmem [thread:$0]  %s44_s7, 1024, %s46_s8, [#allocation6], %s440_s26, %s440_s26, %s441_s27  }
   0xb   :  { %433 = dma.done.wait [#allocation3], 64  }
   0xc   :  { %434 = vsyncadd [#allocation3], 4294967232 }
   0xd   :  { %435 = dma.done.wait [#allocation6], 2048  }
   0xe   :  { %436 = vsyncadd [#allocation6], 4294965248  ;;  %v320_v0 = vld [vmem:[#allocation5 + $0x38] sm:$0xff]  ;;  %v319_v1 = vld [vmem:[#allocation5 + $0x30] sm:$0xff]  ;;  %s444_s11 = smov [#allocation8]   ;;  %s238_s15 = sshll.u32 %s498_s5, 4  ;;  %s239_s15 = int_to_ptr.hbm [resolvable:$true] %s238_s15 }
   0xf   :  { %135 = vmatpush.bf16.msra.mxu0 %v320_v0  ;;  %v328_v2 = vld [vmem:[#allocation7 + $0x38] sm:$0xff]  ;;  %v327_v3 = vld [vmem:[#allocation7 + $0x30] sm:$0xff]  ;;  %v318_v4 = vld [vmem:[#allocation5 + $0x28] sm:$0xff]  ;;  %s236_s12 = sshll.u32 %s444_s11, 4  ;;  %s237_s12 = int_to_ptr.vmem [resolvable:$true] %s236_s12 }
  0x10   :  { %217 = vmatpush.bf16.msra.mxu1 %v328_v2  ;;  %v326_v5 = vld [vmem:[#allocation7 + $0x28] sm:$0xff]  ;;  %v317_v6 = vld [vmem:[#allocation5 + $0x20] sm:$0xff]  ;;  %v316_v8 = vld [vmem:[#allocation5 + $0x18] sm:$0xff] }
  0x11   :  { %v325_v7 = vld [vmem:[#allocation7 + $0x20] sm:$0xff]  ;;  %v324_v9 = vld [vmem:[#allocation7 + $0x18] sm:$0xff]  ;;  %v315_v10 = vld [vmem:[#allocation5 + $0x10] sm:$0xff] }
  0x12   :  { %v323_v11 = vld [vmem:[#allocation7 + $0x10] sm:$0xff]  ;;  %v314_v12 = vld [vmem:[#allocation5 + $0x8] sm:$0xff]  ;;  %v313_v14 = vld [vmem:[#allocation5] sm:$0xff] }
  0x13   :  { %136 = vmatpush.bf16.msra.mxu0 %v319_v1  ;;  %v322_v13 = vld [vmem:[#allocation7 + $0x8] sm:$0xff]  ;;  %v66_v15 = vld [vmem:[#allocation2] sm:$0xf]  ;;  %v321_v16 = vld [vmem:[#allocation7] sm:$0xff] }
  0x14   :  { %218 = vmatpush.bf16.msra.mxu1 %v327_v3  ;;  %v335_v17 = vld [vmem:[%s495_s2] ss:$0 sm:$0xff] }
  0x15   :  { %v336_v22 = vld [vmem:[%s497_s4] ss:$0 sm:$0xff] }
  0x17   :  { %137 = vmatpush.bf16.msra.mxu0 %v318_v4 }
  0x18   :  { %219 = vmatpush.bf16.msra.mxu1 %v326_v5 }
  0x1b   :  { %138 = vmatpush.bf16.msra.mxu0 %v317_v6 }
  0x1c   :  { %220 = vmatpush.bf16.msra.mxu1 %v325_v7 }
  0x1f   :  { %139 = vmatpush.bf16.msra.mxu0 %v316_v8 }
  0x20   :  { %221 = vmatpush.bf16.msra.mxu1 %v324_v9 }
  0x23   :  { %140 = vmatpush.bf16.msra.mxu0 %v315_v10 }
  0x24   :  { %222 = vmatpush.bf16.msra.mxu1 %v323_v11 }
  0x27   :  { %141 = vmatpush.bf16.msra.mxu0 %v314_v12 }
  0x28   :  { %223 = vmatpush.bf16.msra.mxu1 %v322_v13 }
  0x2b   :  { %142 = vmatpush.bf16.msra.mxu0 %v313_v14 }
  0x2c   :  { %224 = vmatpush.bf16.msra.mxu1 %v321_v16 }
  0x2e   :  { %143 = vmatmul.bf16.vlgmr.msra.gmra.mxu0 %v66_v15 }
  0xab   :  { %v144_v18 = vpop.f32.mrf.mxu0 }
  0xac   :  { %v145_v19 = vadd.f32 %v335_v17, %v144_v18 }
  0xae   :  { %v148_v20 = vpack.c.bf16 %v145_v19, %v145_v19 }
  0xb0   :  { %225 = vmatmul.bf16.vlgmr.msra.gmra.mxu1 %v148_v20 }
  0xb3   :  { %v146_v21 = vpop.f32.mrf.mxu0 }
 0x12d   :  { %v226_v23 = vpop.f32.mrf.mxu1 }
 0x12e   :  { %v227_v24 = vadd.f32 %v336_v22, %v226_v23 }
 0x130   :  { %230 = vst [vmem:[#allocation8] sm:$0xff] %v227_v24 }
 0x131   :  { %241 = dma.vmem_to_hbm [thread:$0]  %s237_s12, 128, %s239_s15, [#allocation4]  }
 0x135   :  { %v228_v25 = vpop.f32.mrf.mxu1 }
 0x136   :  { %437 = dma.done.wait [#allocation4], 128  }
 0x137   :  { %438 = vsyncadd [#allocation4], 4294967168 }
 0x138   :  { %246 = vsyncpa [#allocation3], 1 }
 0x139   :  { %247 = vsyncpa [#allocation6], 1 }
 0x13a   :  { %248 = vsyncpa [#allocation4], 1 }

</bundles_post_ra>
